<compile_context>
chip_gen: v5e
topology: v5e:2x2
jax: 0.10.0
libtpu: 0.0.40
codegen_flags: <defaults>
</compile_context>

<pallas_src>
import numpy as np
import jax
import jax.numpy as jnp
from jax import lax
from jax.experimental import pallas as pl
from jax.experimental.pallas import tpu as pltpu

_LANES = 128
_SUBLANES = 8
_N_DRAWS = 12  # Irwin-Hall: sum of 12 U(0,1) - 6 has mean 0, variance 1.


def _round_up(x, m):
    return (x + m - 1) // m * m


def _i32(v):
    """32-bit constant with uint32 -> int32 wraparound (no Python overflow)."""
    return np.uint32(v & 0xFFFFFFFF).astype(np.int32)


# lowbias32-style avalanche mixer constants (all int32 arithmetic wraps mod 2^32).
_M1 = _i32(0x7FEB352D)
_M2 = _i32(0x846CA68B)
_GOLD = _i32(0x9E3779B1)
_STREAM = 0x85157AF5


def _mix32(x):
    """Avalanche mixer on int32 (logical shifts, wrapping multiplies)."""
    x = jnp.bitwise_xor(x, lax.shift_right_logical(x, 16))
    x = x * _M1
    x = jnp.bitwise_xor(x, lax.shift_right_logical(x, 15))
    x = x * _M2
    x = jnp.bitwise_xor(x, lax.shift_right_logical(x, 16))
    return x


def _make_noise_kernel(stddev, block_rows):
    inv24 = np.float32(1.0 / (1 << 24))
    half = np.float32(_N_DRAWS / 2.0)
    std = np.float32(stddev)
    mask24 = np.int32(0x00FFFFFF)

    def kernel(seed_ref, x_ref, o_ref):
        shape = x_ref.shape
        row = lax.broadcasted_iota(jnp.int32, shape, 0)
        col = lax.broadcasted_iota(jnp.int32, shape, 1)
        # Global element index -> noise does not depend on the grid split,
        # so the grid axis can be freely sharded across TensorCores.
        gidx = (pl.program_id(0) * np.int32(block_rows) + row) * np.int32(_LANES) + col
        state = _mix32(gidx + seed_ref[0] * _GOLD)

        acc = jnp.zeros(shape, jnp.float32)
        for k in range(_N_DRAWS):
            h = _mix32(state + _i32(k * _STREAM))
            u = jnp.bitwise_and(h, mask24).astype(jnp.float32) * inv24  # U[0,1)
            acc = acc + u
        noise = acc - half  # ~ N(0, 1)

        y = x_ref[...].astype(jnp.float32) + std * noise
        o_ref[...] = y.astype(o_ref.dtype)

    return kernel


def gaussian_noise(x, stddev, *, seed=0, training=True, max_block_rows=512):
    """GaussianNoise forward pass. Training adds N(0, stddev^2) noise."""
    if (not training) or stddev == 0.0:
        return x  # eval mode: exact identity, no kernel launch

    orig_shape = x.shape
    n = int(np.prod(orig_shape))

    # Flatten to a lane-dense (rows, 128) slab; rows padded to a sublane
    # multiple and to a whole number of blocks.
    rows_needed = _round_up(pl.cdiv(n, _LANES), _SUBLANES)
    block_rows = min(max_block_rows, rows_needed)
    rows = _round_up(rows_needed, block_rows)
    n_pad = rows * _LANES

    x_flat = x.reshape(-1)
    if n_pad != n:
        x_flat = jnp.pad(x_flat, (0, n_pad - n))
    x2d = x_flat.reshape(rows, _LANES)

    seed_arr = jnp.asarray([seed], dtype=jnp.int32)
    grid = (rows // block_rows,)

    out2d = pl.pallas_call(
        _make_noise_kernel(float(stddev), block_rows),
        out_shape=jax.ShapeDtypeStruct((rows, _LANES), x.dtype),
        grid_spec=pltpu.PrefetchScalarGridSpec(
            num_scalar_prefetch=1,
            grid=grid,
            in_specs=[pl.BlockSpec((block_rows, _LANES),
                                   lambda i, seed_ref: (i, 0))],
            out_specs=pl.BlockSpec((block_rows, _LANES),
                                   lambda i, seed_ref: (i, 0)),
        ),
        compiler_params=pltpu.CompilerParams(
            dimension_semantics=("parallel",)),
    )(seed_arr, x2d)

    return out2d.reshape(-1)[:n].reshape(orig_shape)


if __name__ == "__main__":
    # Shapes consistent with the module usage: batch=2, channels=4, 16x16.
    N, C, H, W = 2, 4, 16, 16
    stddev = 0.5

    key = jax.random.PRNGKey(0)
    x = jax.random.normal(key, (N, C, H, W), jnp.float32)

    # Training-mode forward: x + stddev * N(0, 1).
    out = gaussian_noise(x, stddev, seed=1234, training=True)
    out = jax.block_until_ready(out)
    assert out.shape == x.shape and out.dtype == x.dtype

    # Statistical check of the in-kernel noise (2048 samples).
    noise = np.asarray(out) - np.asarray(x)
    m, s = float(noise.mean()), float(noise.std())
    assert abs(m) < 0.1, f"noise mean {m} too far from 0"
    assert 0.35 < s < 0.65, f"noise std {s} too far from stddev={stddev}"

    # Determinism: same seed -> identical output; different seed -> different.
    out_same = jax.block_until_ready(
        gaussian_noise(x, stddev, seed=1234, training=True))
    np.testing.assert_array_equal(np.asarray(out), np.asarray(out_same))
    out_diff = jax.block_until_ready(
        gaussian_noise(x, stddev, seed=99, training=True))
    assert not np.array_equal(np.asarray(out), np.asarray(out_diff))

    # Eval-mode forward (self.training == False): exact identity.
    out_eval = jax.block_until_ready(
        gaussian_noise(x, stddev, training=False))
    np.testing.assert_array_equal(np.asarray(out_eval), np.asarray(x))

    print("KERNEL_OK")
</pallas_src>

<mosaic_0001>
module attributes {stable_mosaic.version = 11 : i64} {
  func.func @kernel(%arg0: i32, %arg1: memref<1xi32, #tpu.memory_space<smem>>, %arg2: memref<16x128xf32, #tpu.memory_space<vmem>>, %arg3: memref<16x128xf32, #tpu.memory_space<vmem>>) attributes {dimension_semantics = [#tpu.dimension_semantics<parallel>], iteration_bounds = array<i64: 1>, scalar_prefetch = 1 : i64, scratch_operands = 0 : i64, tpu.core_type = #tpu.core_type<tc>, window_params = [{transform_indices = @transform_0, window_bounds = array<i64: 16, 128>}, {transform_indices = @transform_1, window_bounds = array<i64: 16, 128>}]} {
    %0 = tpu.iota {dimensions = array<i32: 0>} : vector<16x128xi32>
    %1 = tpu.iota {dimensions = array<i32: 1>} : vector<16x128xi32>
    %c16_i32 = arith.constant 16 : i32
    %2 = arith.muli %arg0, %c16_i32 : i32
    %3 = vector.broadcast %2 : i32 to vector<16x128xi32>
    %4 = arith.addi %3, %0 : vector<16x128xi32>
    %c128_i32 = arith.constant 128 : i32
    %5 = vector.broadcast %c128_i32 : i32 to vector<16x128xi32>
    %6 = arith.muli %4, %5 : vector<16x128xi32>
    %7 = arith.addi %6, %1 : vector<16x128xi32>
    %c0 = arith.constant 0 : index
    %8 = memref.load %arg1[%c0] : memref<1xi32, #tpu.memory_space<smem>>
    %c-1640531535_i32 = arith.constant -1640531535 : i32
    %9 = arith.muli %8, %c-1640531535_i32 : i32
    %10 = vector.broadcast %9 : i32 to vector<16x128xi32>
    %11 = arith.addi %7, %10 : vector<16x128xi32>
    %c16_i32_0 = arith.constant 16 : i32
    %12 = vector.broadcast %c16_i32_0 : i32 to vector<16x128xi32>
    %13 = arith.shrui %11, %12 : vector<16x128xi32>
    %14 = arith.xori %11, %13 : vector<16x128xi32>
    %c2146121005_i32 = arith.constant 2146121005 : i32
    %15 = vector.broadcast %c2146121005_i32 : i32 to vector<16x128xi32>
    %16 = arith.muli %14, %15 : vector<16x128xi32>
    %c15_i32 = arith.constant 15 : i32
    %17 = vector.broadcast %c15_i32 : i32 to vector<16x128xi32>
    %18 = arith.shrui %16, %17 : vector<16x128xi32>
    %19 = arith.xori %16, %18 : vector<16x128xi32>
    %c-2073254261_i32 = arith.constant -2073254261 : i32
    %20 = vector.broadcast %c-2073254261_i32 : i32 to vector<16x128xi32>
    %21 = arith.muli %19, %20 : vector<16x128xi32>
    %c16_i32_1 = arith.constant 16 : i32
    %22 = vector.broadcast %c16_i32_1 : i32 to vector<16x128xi32>
    %23 = arith.shrui %21, %22 : vector<16x128xi32>
    %24 = arith.xori %21, %23 : vector<16x128xi32>
    %cst = arith.constant 0.000000e+00 : f32
    %25 = vector.broadcast %cst : f32 to vector<16x128xf32>
    %c0_i32 = arith.constant 0 : i32
    %26 = vector.broadcast %c0_i32 : i32 to vector<16x128xi32>
    %27 = arith.addi %24, %26 : vector<16x128xi32>
    %c16_i32_2 = arith.constant 16 : i32
    %28 = vector.broadcast %c16_i32_2 : i32 to vector<16x128xi32>
    %29 = arith.shrui %27, %28 : vector<16x128xi32>
    %30 = arith.xori %27, %29 : vector<16x128xi32>
    %c2146121005_i32_3 = arith.constant 2146121005 : i32
    %31 = vector.broadcast %c2146121005_i32_3 : i32 to vector<16x128xi32>
    %32 = arith.muli %30, %31 : vector<16x128xi32>
    %c15_i32_4 = arith.constant 15 : i32
    %33 = vector.broadcast %c15_i32_4 : i32 to vector<16x128xi32>
    %34 = arith.shrui %32, %33 : vector<16x128xi32>
    %35 = arith.xori %32, %34 : vector<16x128xi32>
    %c-2073254261_i32_5 = arith.constant -2073254261 : i32
    %36 = vector.broadcast %c-2073254261_i32_5 : i32 to vector<16x128xi32>
    %37 = arith.muli %35, %36 : vector<16x128xi32>
    %c16_i32_6 = arith.constant 16 : i32
    %38 = vector.broadcast %c16_i32_6 : i32 to vector<16x128xi32>
    %39 = arith.shrui %37, %38 : vector<16x128xi32>
    %40 = arith.xori %37, %39 : vector<16x128xi32>
    %c16777215_i32 = arith.constant 16777215 : i32
    %41 = vector.broadcast %c16777215_i32 : i32 to vector<16x128xi32>
    %42 = arith.andi %40, %41 : vector<16x128xi32>
    %43 = arith.sitofp %42 : vector<16x128xi32> to vector<16x128xf32>
    %cst_7 = arith.constant 5.96046448E-8 : f32
    %44 = vector.broadcast %cst_7 : f32 to vector<16x128xf32>
    %45 = arith.mulf %43, %44 : vector<16x128xf32>
    %46 = arith.addf %25, %45 : vector<16x128xf32>
    %c-2062189835_i32 = arith.constant -2062189835 : i32
    %47 = vector.broadcast %c-2062189835_i32 : i32 to vector<16x128xi32>
    %48 = arith.addi %24, %47 : vector<16x128xi32>
    %c16_i32_8 = arith.constant 16 : i32
    %49 = vector.broadcast %c16_i32_8 : i32 to vector<16x128xi32>
    %50 = arith.shrui %48, %49 : vector<16x128xi32>
    %51 = arith.xori %48, %50 : vector<16x128xi32>
    %c2146121005_i32_9 = arith.constant 2146121005 : i32
    %52 = vector.broadcast %c2146121005_i32_9 : i32 to vector<16x128xi32>
    %53 = arith.muli %51, %52 : vector<16x128xi32>
    %c15_i32_10 = arith.constant 15 : i32
    %54 = vector.broadcast %c15_i32_10 : i32 to vector<16x128xi32>
    %55 = arith.shrui %53, %54 : vector<16x128xi32>
    %56 = arith.xori %53, %55 : vector<16x128xi32>
    %c-2073254261_i32_11 = arith.constant -2073254261 : i32
    %57 = vector.broadcast %c-2073254261_i32_11 : i32 to vector<16x128xi32>
    %58 = arith.muli %56, %57 : vector<16x128xi32>
    %c16_i32_12 = arith.constant 16 : i32
    %59 = vector.broadcast %c16_i32_12 : i32 to vector<16x128xi32>
    %60 = arith.shrui %58, %59 : vector<16x128xi32>
    %61 = arith.xori %58, %60 : vector<16x128xi32>
    %c16777215_i32_13 = arith.constant 16777215 : i32
    %62 = vector.broadcast %c16777215_i32_13 : i32 to vector<16x128xi32>
    %63 = arith.andi %61, %62 : vector<16x128xi32>
    %64 = arith.sitofp %63 : vector<16x128xi32> to vector<16x128xf32>
    %cst_14 = arith.constant 5.96046448E-8 : f32
    %65 = vector.broadcast %cst_14 : f32 to vector<16x128xf32>
    %66 = arith.mulf %64, %65 : vector<16x128xf32>
    %67 = arith.addf %46, %66 : vector<16x128xf32>
    %c170587626_i32 = arith.constant 170587626 : i32
    %68 = vector.broadcast %c170587626_i32 : i32 to vector<16x128xi32>
    %69 = arith.addi %24, %68 : vector<16x128xi32>
    %c16_i32_15 = arith.constant 16 : i32
    %70 = vector.broadcast %c16_i32_15 : i32 to vector<16x128xi32>
    %71 = arith.shrui %69, %70 : vector<16x128xi32>
    %72 = arith.xori %69, %71 : vector<16x128xi32>
    %c2146121005_i32_16 = arith.constant 2146121005 : i32
    %73 = vector.broadcast %c2146121005_i32_16 : i32 to vector<16x128xi32>
    %74 = arith.muli %72, %73 : vector<16x128xi32>
    %c15_i32_17 = arith.constant 15 : i32
    %75 = vector.broadcast %c15_i32_17 : i32 to vector<16x128xi32>
    %76 = arith.shrui %74, %75 : vector<16x128xi32>
    %77 = arith.xori %74, %76 : vector<16x128xi32>
    %c-2073254261_i32_18 = arith.constant -2073254261 : i32
    %78 = vector.broadcast %c-2073254261_i32_18 : i32 to vector<16x128xi32>
    %79 = arith.muli %77, %78 : vector<16x128xi32>
    %c16_i32_19 = arith.constant 16 : i32
    %80 = vector.broadcast %c16_i32_19 : i32 to vector<16x128xi32>
    %81 = arith.shrui %79, %80 : vector<16x128xi32>
    %82 = arith.xori %79, %81 : vector<16x128xi32>
    %c16777215_i32_20 = arith.constant 16777215 : i32
    %83 = vector.broadcast %c16777215_i32_20 : i32 to vector<16x128xi32>
    %84 = arith.andi %82, %83 : vector<16x128xi32>
    %85 = arith.sitofp %84 : vector<16x128xi32> to vector<16x128xf32>
    %cst_21 = arith.constant 5.96046448E-8 : f32
    %86 = vector.broadcast %cst_21 : f32 to vector<16x128xf32>
    %87 = arith.mulf %85, %86 : vector<16x128xf32>
    %88 = arith.addf %67, %87 : vector<16x128xf32>
    %c-1891602209_i32 = arith.constant -1891602209 : i32
    %89 = vector.broadcast %c-1891602209_i32 : i32 to vector<16x128xi32>
    %90 = arith.addi %24, %89 : vector<16x128xi32>
    %c16_i32_22 = arith.constant 16 : i32
    %91 = vector.broadcast %c16_i32_22 : i32 to vector<16x128xi32>
    %92 = arith.shrui %90, %91 : vector<16x128xi32>
    %93 = arith.xori %90, %92 : vector<16x128xi32>
    %c2146121005_i32_23 = arith.constant 2146121005 : i32
    %94 = vector.broadcast %c2146121005_i32_23 : i32 to vector<16x128xi32>
    %95 = arith.muli %93, %94 : vector<16x128xi32>
    %c15_i32_24 = arith.constant 15 : i32
    %96 = vector.broadcast %c15_i32_24 : i32 to vector<16x128xi32>
    %97 = arith.shrui %95, %96 : vector<16x128xi32>
    %98 = arith.xori %95, %97 : vector<16x128xi32>
    %c-2073254261_i32_25 = arith.constant -2073254261 : i32
    %99 = vector.broadcast %c-2073254261_i32_25 : i32 to vector<16x128xi32>
    %100 = arith.muli %98, %99 : vector<16x128xi32>
    %c16_i32_26 = arith.constant 16 : i32
    %101 = vector.broadcast %c16_i32_26 : i32 to vector<16x128xi32>
    %102 = arith.shrui %100, %101 : vector<16x128xi32>
    %103 = arith.xori %100, %102 : vector<16x128xi32>
    %c16777215_i32_27 = arith.constant 16777215 : i32
    %104 = vector.broadcast %c16777215_i32_27 : i32 to vector<16x128xi32>
    %105 = arith.andi %103, %104 : vector<16x128xi32>
    %106 = arith.sitofp %105 : vector<16x128xi32> to vector<16x128xf32>
    %cst_28 = arith.constant 5.96046448E-8 : f32
    %107 = vector.broadcast %cst_28 : f32 to vector<16x128xf32>
    %108 = arith.mulf %106, %107 : vector<16x128xf32>
    %109 = arith.addf %88, %108 : vector<16x128xf32>
    %c341175252_i32 = arith.constant 341175252 : i32
    %110 = vector.broadcast %c341175252_i32 : i32 to vector<16x128xi32>
    %111 = arith.addi %24, %110 : vector<16x128xi32>
    %c16_i32_29 = arith.constant 16 : i32
    %112 = vector.broadcast %c16_i32_29 : i32 to vector<16x128xi32>
    %113 = arith.shrui %111, %112 : vector<16x128xi32>
    %114 = arith.xori %111, %113 : vector<16x128xi32>
    %c2146121005_i32_30 = arith.constant 2146121005 : i32
    %115 = vector.broadcast %c2146121005_i32_30 : i32 to vector<16x128xi32>
    %116 = arith.muli %114, %115 : vector<16x128xi32>
    %c15_i32_31 = arith.constant 15 : i32
    %117 = vector.broadcast %c15_i32_31 : i32 to vector<16x128xi32>
    %118 = arith.shrui %116, %117 : vector<16x128xi32>
    %119 = arith.xori %116, %118 : vector<16x128xi32>
    %c-2073254261_i32_32 = arith.constant -2073254261 : i32
    %120 = vector.broadcast %c-2073254261_i32_32 : i32 to vector<16x128xi32>
    %121 = arith.muli %119, %120 : vector<16x128xi32>
    %c16_i32_33 = arith.constant 16 : i32
    %122 = vector.broadcast %c16_i32_33 : i32 to vector<16x128xi32>
    %123 = arith.shrui %121, %122 : vector<16x128xi32>
    %124 = arith.xori %121, %123 : vector<16x128xi32>
    %c16777215_i32_34 = arith.constant 16777215 : i32
    %125 = vector.broadcast %c16777215_i32_34 : i32 to vector<16x128xi32>
    %126 = arith.andi %124, %125 : vector<16x128xi32>
    %127 = arith.sitofp %126 : vector<16x128xi32> to vector<16x128xf32>
    %cst_35 = arith.constant 5.96046448E-8 : f32
    %128 = vector.broadcast %cst_35 : f32 to vector<16x128xf32>
    %129 = arith.mulf %127, %128 : vector<16x128xf32>
    %130 = arith.addf %109, %129 : vector<16x128xf32>
    %c-1721014583_i32 = arith.constant -1721014583 : i32
    %131 = vector.broadcast %c-1721014583_i32 : i32 to vector<16x128xi32>
    %132 = arith.addi %24, %131 : vector<16x128xi32>
    %c16_i32_36 = arith.constant 16 : i32
    %133 = vector.broadcast %c16_i32_36 : i32 to vector<16x128xi32>
    %134 = arith.shrui %132, %133 : vector<16x128xi32>
    %135 = arith.xori %132, %134 : vector<16x128xi32>
    %c2146121005_i32_37 = arith.constant 2146121005 : i32
    %136 = vector.broadcast %c2146121005_i32_37 : i32 to vector<16x128xi32>
    %137 = arith.muli %135, %136 : vector<16x128xi32>
    %c15_i32_38 = arith.constant 15 : i32
    %138 = vector.broadcast %c15_i32_38 : i32 to vector<16x128xi32>
    %139 = arith.shrui %137, %138 : vector<16x128xi32>
    %140 = arith.xori %137, %139 : vector<16x128xi32>
    %c-2073254261_i32_39 = arith.constant -2073254261 : i32
    %141 = vector.broadcast %c-2073254261_i32_39 : i32 to vector<16x128xi32>
    %142 = arith.muli %140, %141 : vector<16x128xi32>
    %c16_i32_40 = arith.constant 16 : i32
    %143 = vector.broadcast %c16_i32_40 : i32 to vector<16x128xi32>
    %144 = arith.shrui %142, %143 : vector<16x128xi32>
    %145 = arith.xori %142, %144 : vector<16x128xi32>
    %c16777215_i32_41 = arith.constant 16777215 : i32
    %146 = vector.broadcast %c16777215_i32_41 : i32 to vector<16x128xi32>
    %147 = arith.andi %145, %146 : vector<16x128xi32>
    %148 = arith.sitofp %147 : vector<16x128xi32> to vector<16x128xf32>
    %cst_42 = arith.constant 5.96046448E-8 : f32
    %149 = vector.broadcast %cst_42 : f32 to vector<16x128xf32>
    %150 = arith.mulf %148, %149 : vector<16x128xf32>
    %151 = arith.addf %130, %150 : vector<16x128xf32>
    %c511762878_i32 = arith.constant 511762878 : i32
    %152 = vector.broadcast %c511762878_i32 : i32 to vector<16x128xi32>
    %153 = arith.addi %24, %152 : vector<16x128xi32>
    %c16_i32_43 = arith.constant 16 : i32
    %154 = vector.broadcast %c16_i32_43 : i32 to vector<16x128xi32>
    %155 = arith.shrui %153, %154 : vector<16x128xi32>
    %156 = arith.xori %153, %155 : vector<16x128xi32>
    %c2146121005_i32_44 = arith.constant 2146121005 : i32
    %157 = vector.broadcast %c2146121005_i32_44 : i32 to vector<16x128xi32>
    %158 = arith.muli %156, %157 : vector<16x128xi32>
    %c15_i32_45 = arith.constant 15 : i32
    %159 = vector.broadcast %c15_i32_45 : i32 to vector<16x128xi32>
    %160 = arith.shrui %158, %159 : vector<16x128xi32>
    %161 = arith.xori %158, %160 : vector<16x128xi32>
    %c-2073254261_i32_46 = arith.constant -2073254261 : i32
    %162 = vector.broadcast %c-2073254261_i32_46 : i32 to vector<16x128xi32>
    %163 = arith.muli %161, %162 : vector<16x128xi32>
    %c16_i32_47 = arith.constant 16 : i32
    %164 = vector.broadcast %c16_i32_47 : i32 to vector<16x128xi32>
    %165 = arith.shrui %163, %164 : vector<16x128xi32>
    %166 = arith.xori %163, %165 : vector<16x128xi32>
    %c16777215_i32_48 = arith.constant 16777215 : i32
    %167 = vector.broadcast %c16777215_i32_48 : i32 to vector<16x128xi32>
    %168 = arith.andi %166, %167 : vector<16x128xi32>
    %169 = arith.sitofp %168 : vector<16x128xi32> to vector<16x128xf32>
    %cst_49 = arith.constant 5.96046448E-8 : f32
    %170 = vector.broadcast %cst_49 : f32 to vector<16x128xf32>
    %171 = arith.mulf %169, %170 : vector<16x128xf32>
    %172 = arith.addf %151, %171 : vector<16x128xf32>
    %c-1550426957_i32 = arith.constant -1550426957 : i32
    %173 = vector.broadcast %c-1550426957_i32 : i32 to vector<16x128xi32>
    %174 = arith.addi %24, %173 : vector<16x128xi32>
    %c16_i32_50 = arith.constant 16 : i32
    %175 = vector.broadcast %c16_i32_50 : i32 to vector<16x128xi32>
    %176 = arith.shrui %174, %175 : vector<16x128xi32>
    %177 = arith.xori %174, %176 : vector<16x128xi32>
    %c2146121005_i32_51 = arith.constant 2146121005 : i32
    %178 = vector.broadcast %c2146121005_i32_51 : i32 to vector<16x128xi32>
    %179 = arith.muli %177, %178 : vector<16x128xi32>
    %c15_i32_52 = arith.constant 15 : i32
    %180 = vector.broadcast %c15_i32_52 : i32 to vector<16x128xi32>
    %181 = arith.shrui %179, %180 : vector<16x128xi32>
    %182 = arith.xori %179, %181 : vector<16x128xi32>
    %c-2073254261_i32_53 = arith.constant -2073254261 : i32
    %183 = vector.broadcast %c-2073254261_i32_53 : i32 to vector<16x128xi32>
    %184 = arith.muli %182, %183 : vector<16x128xi32>
    %c16_i32_54 = arith.constant 16 : i32
    %185 = vector.broadcast %c16_i32_54 : i32 to vector<16x128xi32>
    %186 = arith.shrui %184, %185 : vector<16x128xi32>
    %187 = arith.xori %184, %186 : vector<16x128xi32>
    %c16777215_i32_55 = arith.constant 16777215 : i32
    %188 = vector.broadcast %c16777215_i32_55 : i32 to vector<16x128xi32>
    %189 = arith.andi %187, %188 : vector<16x128xi32>
    %190 = arith.sitofp %189 : vector<16x128xi32> to vector<16x128xf32>
    %cst_56 = arith.constant 5.96046448E-8 : f32
    %191 = vector.broadcast %cst_56 : f32 to vector<16x128xf32>
    %192 = arith.mulf %190, %191 : vector<16x128xf32>
    %193 = arith.addf %172, %192 : vector<16x128xf32>
    %c682350504_i32 = arith.constant 682350504 : i32
    %194 = vector.broadcast %c682350504_i32 : i32 to vector<16x128xi32>
    %195 = arith.addi %24, %194 : vector<16x128xi32>
    %c16_i32_57 = arith.constant 16 : i32
    %196 = vector.broadcast %c16_i32_57 : i32 to vector<16x128xi32>
    %197 = arith.shrui %195, %196 : vector<16x128xi32>
    %198 = arith.xori %195, %197 : vector<16x128xi32>
    %c2146121005_i32_58 = arith.constant 2146121005 : i32
    %199 = vector.broadcast %c2146121005_i32_58 : i32 to vector<16x128xi32>
    %200 = arith.muli %198, %199 : vector<16x128xi32>
    %c15_i32_59 = arith.constant 15 : i32
    %201 = vector.broadcast %c15_i32_59 : i32 to vector<16x128xi32>
    %202 = arith.shrui %200, %201 : vector<16x128xi32>
    %203 = arith.xori %200, %202 : vector<16x128xi32>
    %c-2073254261_i32_60 = arith.constant -2073254261 : i32
    %204 = vector.broadcast %c-2073254261_i32_60 : i32 to vector<16x128xi32>
    %205 = arith.muli %203, %204 : vector<16x128xi32>
    %c16_i32_61 = arith.constant 16 : i32
    %206 = vector.broadcast %c16_i32_61 : i32 to vector<16x128xi32>
    %207 = arith.shrui %205, %206 : vector<16x128xi32>
    %208 = arith.xori %205, %207 : vector<16x128xi32>
    %c16777215_i32_62 = arith.constant 16777215 : i32
    %209 = vector.broadcast %c16777215_i32_62 : i32 to vector<16x128xi32>
    %210 = arith.andi %208, %209 : vector<16x128xi32>
    %211 = arith.sitofp %210 : vector<16x128xi32> to vector<16x128xf32>
    %cst_63 = arith.constant 5.96046448E-8 : f32
    %212 = vector.broadcast %cst_63 : f32 to vector<16x128xf32>
    %213 = arith.mulf %211, %212 : vector<16x128xf32>
    %214 = arith.addf %193, %213 : vector<16x128xf32>
    %c-1379839331_i32 = arith.constant -1379839331 : i32
    %215 = vector.broadcast %c-1379839331_i32 : i32 to vector<16x128xi32>
    %216 = arith.addi %24, %215 : vector<16x128xi32>
    %c16_i32_64 = arith.constant 16 : i32
    %217 = vector.broadcast %c16_i32_64 : i32 to vector<16x128xi32>
    %218 = arith.shrui %216, %217 : vector<16x128xi32>
    %219 = arith.xori %216, %218 : vector<16x128xi32>
    %c2146121005_i32_65 = arith.constant 2146121005 : i32
    %220 = vector.broadcast %c2146121005_i32_65 : i32 to vector<16x128xi32>
    %221 = arith.muli %219, %220 : vector<16x128xi32>
    %c15_i32_66 = arith.constant 15 : i32
    %222 = vector.broadcast %c15_i32_66 : i32 to vector<16x128xi32>
    %223 = arith.shrui %221, %222 : vector<16x128xi32>
    %224 = arith.xori %221, %223 : vector<16x128xi32>
    %c-2073254261_i32_67 = arith.constant -2073254261 : i32
    %225 = vector.broadcast %c-2073254261_i32_67 : i32 to vector<16x128xi32>
    %226 = arith.muli %224, %225 : vector<16x128xi32>
    %c16_i32_68 = arith.constant 16 : i32
    %227 = vector.broadcast %c16_i32_68 : i32 to vector<16x128xi32>
    %228 = arith.shrui %226, %227 : vector<16x128xi32>
    %229 = arith.xori %226, %228 : vector<16x128xi32>
    %c16777215_i32_69 = arith.constant 16777215 : i32
    %230 = vector.broadcast %c16777215_i32_69 : i32 to vector<16x128xi32>
    %231 = arith.andi %229, %230 : vector<16x128xi32>
    %232 = arith.sitofp %231 : vector<16x128xi32> to vector<16x128xf32>
    %cst_70 = arith.constant 5.96046448E-8 : f32
    %233 = vector.broadcast %cst_70 : f32 to vector<16x128xf32>
    %234 = arith.mulf %232, %233 : vector<16x128xf32>
    %235 = arith.addf %214, %234 : vector<16x128xf32>
    %c852938130_i32 = arith.constant 852938130 : i32
    %236 = vector.broadcast %c852938130_i32 : i32 to vector<16x128xi32>
    %237 = arith.addi %24, %236 : vector<16x128xi32>
    %c16_i32_71 = arith.constant 16 : i32
    %238 = vector.broadcast %c16_i32_71 : i32 to vector<16x128xi32>
    %239 = arith.shrui %237, %238 : vector<16x128xi32>
    %240 = arith.xori %237, %239 : vector<16x128xi32>
    %c2146121005_i32_72 = arith.constant 2146121005 : i32
    %241 = vector.broadcast %c2146121005_i32_72 : i32 to vector<16x128xi32>
    %242 = arith.muli %240, %241 : vector<16x128xi32>
    %c15_i32_73 = arith.constant 15 : i32
    %243 = vector.broadcast %c15_i32_73 : i32 to vector<16x128xi32>
    %244 = arith.shrui %242, %243 : vector<16x128xi32>
    %245 = arith.xori %242, %244 : vector<16x128xi32>
    %c-2073254261_i32_74 = arith.constant -2073254261 : i32
    %246 = vector.broadcast %c-2073254261_i32_74 : i32 to vector<16x128xi32>
    %247 = arith.muli %245, %246 : vector<16x128xi32>
    %c16_i32_75 = arith.constant 16 : i32
    %248 = vector.broadcast %c16_i32_75 : i32 to vector<16x128xi32>
    %249 = arith.shrui %247, %248 : vector<16x128xi32>
    %250 = arith.xori %247, %249 : vector<16x128xi32>
    %c16777215_i32_76 = arith.constant 16777215 : i32
    %251 = vector.broadcast %c16777215_i32_76 : i32 to vector<16x128xi32>
    %252 = arith.andi %250, %251 : vector<16x128xi32>
    %253 = arith.sitofp %252 : vector<16x128xi32> to vector<16x128xf32>
    %cst_77 = arith.constant 5.96046448E-8 : f32
    %254 = vector.broadcast %cst_77 : f32 to vector<16x128xf32>
    %255 = arith.mulf %253, %254 : vector<16x128xf32>
    %256 = arith.addf %235, %255 : vector<16x128xf32>
    %c-1209251705_i32 = arith.constant -1209251705 : i32
    %257 = vector.broadcast %c-1209251705_i32 : i32 to vector<16x128xi32>
    %258 = arith.addi %24, %257 : vector<16x128xi32>
    %c16_i32_78 = arith.constant 16 : i32
    %259 = vector.broadcast %c16_i32_78 : i32 to vector<16x128xi32>
    %260 = arith.shrui %258, %259 : vector<16x128xi32>
    %261 = arith.xori %258, %260 : vector<16x128xi32>
    %c2146121005_i32_79 = arith.constant 2146121005 : i32
    %262 = vector.broadcast %c2146121005_i32_79 : i32 to vector<16x128xi32>
    %263 = arith.muli %261, %262 : vector<16x128xi32>
    %c15_i32_80 = arith.constant 15 : i32
    %264 = vector.broadcast %c15_i32_80 : i32 to vector<16x128xi32>
    %265 = arith.shrui %263, %264 : vector<16x128xi32>
    %266 = arith.xori %263, %265 : vector<16x128xi32>
    %c-2073254261_i32_81 = arith.constant -2073254261 : i32
    %267 = vector.broadcast %c-2073254261_i32_81 : i32 to vector<16x128xi32>
    %268 = arith.muli %266, %267 : vector<16x128xi32>
    %c16_i32_82 = arith.constant 16 : i32
    %269 = vector.broadcast %c16_i32_82 : i32 to vector<16x128xi32>
    %270 = arith.shrui %268, %269 : vector<16x128xi32>
    %271 = arith.xori %268, %270 : vector<16x128xi32>
    %c16777215_i32_83 = arith.constant 16777215 : i32
    %272 = vector.broadcast %c16777215_i32_83 : i32 to vector<16x128xi32>
    %273 = arith.andi %271, %272 : vector<16x128xi32>
    %274 = arith.sitofp %273 : vector<16x128xi32> to vector<16x128xf32>
    %cst_84 = arith.constant 5.96046448E-8 : f32
    %275 = vector.broadcast %cst_84 : f32 to vector<16x128xf32>
    %276 = arith.mulf %274, %275 : vector<16x128xf32>
    %277 = arith.addf %256, %276 : vector<16x128xf32>
    %cst_85 = arith.constant 6.000000e+00 : f32
    %278 = vector.broadcast %cst_85 : f32 to vector<16x128xf32>
    %279 = arith.subf %277, %278 : vector<16x128xf32>
    %c0_86 = arith.constant 0 : index
    %c0_87 = arith.constant 0 : index
    %280 = vector.load %arg2[%c0_86, %c0_87] : memref<16x128xf32, #tpu.memory_space<vmem>>, vector<16x128xf32>
    %cst_88 = arith.constant 5.000000e-01 : f32
    %281 = vector.broadcast %cst_88 : f32 to vector<16x128xf32>
    %282 = arith.mulf %281, %279 : vector<16x128xf32>
    %283 = arith.addf %280, %282 : vector<16x128xf32>
    %c0_89 = arith.constant 0 : index
    %c0_90 = arith.constant 0 : index
    %284 = vector.load %arg3[%c0_89, %c0_90] : memref<16x128xf32, #tpu.memory_space<vmem>>, vector<16x128xf32>
    tpu.vector_store %arg3[%c0_89, %c0_90], %283 {strides = array<i32>} : memref<16x128xf32, #tpu.memory_space<vmem>>, vector<16x128xf32>,
    return
  }
  func.func @transform_0(%arg0: i32, %arg1: memref<1xi32, #tpu.memory_space<smem>>) -> (i32, i32) {
    %c0_i32 = arith.constant 0 : i32
    %c0_i32_0 = arith.constant 0 : i32
    return %arg0, %c0_i32 : i32, i32
  }
  func.func @transform_1(%arg0: i32, %arg1: memref<1xi32, #tpu.memory_space<smem>>) -> (i32, i32) {
    %c0_i32 = arith.constant 0 : i32
    %c0_i32_0 = arith.constant 0 : i32
    return %arg0, %c0_i32 : i32, i32
  }
}

</mosaic_0001>

<bundles_post_ra>
// kernel: tpu_custom_call.1
= control target key start
LH: loop header
LB: loop body
LE: loop exit
PB: predicated region body
PF: predicated region fallthrough
CT: control target
= control target key end

     0   :  { %8 = vsyncpa [#allocation5], 0  ;;  %s542_s0 = inlined_call_operand.<no memory space> [shape: s32[1], index: 0, kind: input, shape index: {}]   ;;  %s543_s1 = inlined_call_operand.hbm [shape: f32[16,128], index: 1, kind: input, shape index: {}]   ;;  %s544_s2 = inlined_call_operand.hbm [shape: f32[16,128], index: 2, kind: output, shape index: {}]  }
   0x1   :  { %9 = vsyncpa [#allocation6], 0  ;;  %s14_s11 = sshll.u32 %s543_s1, 4  ;;  %s458_s12 = smov [#allocation4]   ;;  %s15_s11 = int_to_ptr.hbm [resolvable:$true] %s14_s11 }
   0x2   :  { %s16_s13 = sshll.u32 %s458_s12, 4  ;;  %s459_s14 = smov 128   ;;  %s17_s13 = int_to_ptr.vmem [resolvable:$true] %s16_s13 }
   0x3   :  { %s460_s15 = smov 8  }
   0x4   :  { %22 = dma.hbm_to_vmem [thread:$0]  %s15_s11, 256, %s17_s13, [#allocation5], %s459_s14, %s459_s14, %s460_s15  }
   0x5   :  { %454 = dma.done.wait [#allocation5], 256  }
   0x6   :  { %455 = vsyncadd [#allocation5], 4294967040  ;;  %v27_v0 = vlaneseq  ;;  %s41_s18 = smul.u32 2654435761, %s542_s0  ;;  %s461_s0 = smov [#allocation7]  }
   0x7   :  { %s385_s1 = sshll.u32 %s461_s0, 4  ;;  %s387_s21 = sshll.u32 %s544_s2, 4  ;;  %s386_s1 = int_to_ptr.vmem [resolvable:$true] %s385_s1  ;;  %s388_s21 = int_to_ptr.hbm [resolvable:$true] %s387_s21 }
   0x8   :  { %v28_v1 = vshrl.u32 %v27_v0, 7  ;;  %v31_v2 = vand.u32 127, %v27_v0  ;;  %v42_v5 = vstv %s41_s18 }
   0xa   :  { %v29_v3 = vadd.s32 8, %v28_v1  ;;  %v36_v4 = vmul.u32 128, %v28_v1 }
   0xc   :  { %v37_v6 = vmul.u32 128, %v29_v3  ;;  %v38_v7 = vadd.s32 %v36_v4, %v31_v2 }
   0xe   :  { %v39_v8 = vadd.s32 %v37_v6, %v31_v2  ;;  %v43_v9 = vadd.s32 %v42_v5, %v38_v7 }
  0x10   :  { %v44_v10 = vadd.s32 %v42_v5, %v39_v8  ;;  %v45_v11 = vshrl.u32 %v43_v9, 16 }
  0x12   :  { %v46_v12 = vshrl.u32 %v44_v10, 16  ;;  %v47_v13 = vxor.u32 %v45_v11, %v43_v9 }
  0x14   :  { %v48_v14 = vxor.u32 %v46_v12, %v44_v10  ;;  %v49_v15 = vmul.u32 2146121005, %v47_v13 }
  0x16   :  { %v50_v16 = vmul.u32 2146121005, %v48_v14  ;;  %v51_v17 = vshrl.u32 %v49_v15, 15 }
  0x18   :  { %v52_v18 = vshrl.u32 %v50_v16, 15  ;;  %v53_v19 = vxor.u32 %v51_v17, %v49_v15 }
  0x1a   :  { %v54_v20 = vxor.u32 %v52_v18, %v50_v16  ;;  %v55_v21 = vmul.u32 2221713035, %v53_v19 }
  0x1c   :  { %v56_v22 = vmul.u32 2221713035, %v54_v20  ;;  %v57_v23 = vshrl.u32 %v55_v21, 16 }
  0x1e   :  { %v58_v24 = vshrl.u32 %v56_v22, 16  ;;  %v486_v25 = vxor.u32 %v57_v23, %v55_v21 }
  0x20   :  { %v488_v26 = vxor.u32 %v58_v24, %v56_v22  ;;  %v61_v27 = vshrl.u32 %v486_v25, 16  ;;  %v85_v28 = vadd.s32 2232777461, %v486_v25  ;;  %v111_v29 = vadd.s32 170587626, %v486_v25 }
  0x21   :  { %v137_v30 = vadd.s32 2403365087, %v486_v25  ;;  %v495_v31 = vadd.s32 341175252, %v486_v25  ;;  %v498_v32 = vadd.s32 2573952713, %v486_v25 }
  0x22   :  { %v62_v33 = vshrl.u32 %v488_v26, 16  ;;  %v63_v34 = vxor.u32 %v61_v27, %v486_v25  ;;  %v86_v35 = vadd.s32 2232777461, %v488_v26  ;;  %v87_v36 = vshrl.u32 %v85_v28, 16 }
  0x23   :  { %v112_v37 = vadd.s32 170587626, %v488_v26  ;;  %v113_v38 = vshrl.u32 %v111_v29, 16  ;;  %v138_v39 = vadd.s32 2403365087, %v488_v26  ;;  %v139_v40 = vshrl.u32 %v137_v30, 16 }
  0x24   :  { %v64_v41 = vxor.u32 %v62_v33, %v488_v26  ;;  %v65_v42 = vmul.u32 2146121005, %v63_v34  ;;  %v88_v43 = vshrl.u32 %v86_v35, 16  ;;  %v89_v44 = vxor.u32 %v87_v36, %v85_v28 }
  0x25   :  { %v114_v45 = vshrl.u32 %v112_v37, 16  ;;  %v115_v46 = vxor.u32 %v113_v38, %v111_v29  ;;  %v140_v47 = vshrl.u32 %v138_v39, 16  ;;  %v141_v48 = vxor.u32 %v139_v40, %v137_v30 }
  0x26   :  { %v66_v49 = vmul.u32 2146121005, %v64_v41  ;;  %v67_v50 = vshrl.u32 %v65_v42, 15  ;;  %v90_v51 = vxor.u32 %v88_v43, %v86_v35  ;;  %v91_v52 = vmul.u32 2146121005, %v89_v44 }
  0x27   :  { %v116_v53 = vxor.u32 %v114_v45, %v112_v37  ;;  %v117_v54 = vmul.u32 2146121005, %v115_v46  ;;  %v142_v55 = vxor.u32 %v140_v47, %v138_v39  ;;  %v143_v56 = vmul.u32 2146121005, %v141_v48 }
  0x28   :  { %v68_v57 = vshrl.u32 %v66_v49, 15  ;;  %v69_v58 = vxor.u32 %v67_v50, %v65_v42  ;;  %v92_v59 = vmul.u32 2146121005, %v90_v51  ;;  %v93_v60 = vshrl.u32 %v91_v52, 15 }
  0x29   :  { %v118_v61 = vmul.u32 2146121005, %v116_v53  ;;  %v119_v62 = vshrl.u32 %v117_v54, 15  ;;  %v144_v63 = vmul.u32 2146121005, %v142_v55  ;;  %v145_v0 = vshrl.u32 %v143_v56, 15 }
  0x2a   :  { %v70_v1 = vxor.u32 %v68_v57, %v66_v49  ;;  %v71_v2 = vmul.u32 2221713035, %v69_v58  ;;  %v94_v3 = vshrl.u32 %v92_v59, 15  ;;  %v95_v4 = vxor.u32 %v93_v60, %v91_v52 }
  0x2b   :  { %v120_v5 = vshrl.u32 %v118_v61, 15  ;;  %v121_v6 = vxor.u32 %v119_v62, %v117_v54  ;;  %v146_v7 = vshrl.u32 %v144_v63, 15  ;;  %v147_v8 = vxor.u32 %v145_v0, %v143_v56 }
  0x2c   :  { %v72_v9 = vmul.u32 2221713035, %v70_v1  ;;  %v73_v10 = vshrl.u32 %v71_v2, 16  ;;  %v96_v11 = vxor.u32 %v94_v3, %v92_v59  ;;  %v97_v12 = vmul.u32 2221713035, %v95_v4 }
  0x2d   :  { %v122_v13 = vxor.u32 %v120_v5, %v118_v61  ;;  %v123_v14 = vmul.u32 2221713035, %v121_v6  ;;  %v148_v15 = vxor.u32 %v146_v7, %v144_v63  ;;  %v149_v16 = vmul.u32 2221713035, %v147_v8 }
  0x2e   :  { %v74_v17 = vshrl.u32 %v72_v9, 16  ;;  %v75_v18 = vxor.u32 %v73_v10, %v71_v2  ;;  %v98_v19 = vmul.u32 2221713035, %v96_v11  ;;  %v99_v20 = vshrl.u32 %v97_v12, 16 }
  0x2f   :  { %v124_v21 = vmul.u32 2221713035, %v122_v13  ;;  %v125_v22 = vshrl.u32 %v123_v14, 16  ;;  %v150_v23 = vmul.u32 2221713035, %v148_v15  ;;  %v151_v24 = vshrl.u32 %v149_v16, 16 }
  0x30   :  { %v76_v27 = vxor.u32 %v74_v17, %v72_v9  ;;  %v77_v28 = vand.u32 16777215, %v75_v18  ;;  %v100_v29 = vshrl.u32 %v98_v19, 16  ;;  %v101_v30 = vxor.u32 %v99_v20, %v97_v12 }
  0x31   :  { %v126_v33 = vshrl.u32 %v124_v21, 16  ;;  %v127_v34 = vxor.u32 %v125_v22, %v123_v14  ;;  %v152_v35 = vshrl.u32 %v150_v23, 16  ;;  %v153_v36 = vxor.u32 %v151_v24, %v149_v16 }
  0x32   :  { %v78_v37 = vand.u32 16777215, %v76_v27  ;;  %v79_v38 = vcvt.s32.f32 %v77_v28  ;;  %v102_v39 = vxor.u32 %v100_v29, %v98_v19  ;;  %v103_v40 = vand.u32 16777215, %v101_v30 }
  0x33   :  { %v128_v41 = vxor.u32 %v126_v33, %v124_v21  ;;  %v129_v42 = vand.u32 16777215, %v127_v34  ;;  %v154_v43 = vxor.u32 %v152_v35, %v150_v23  ;;  %v155_v44 = vand.u32 16777215, %v153_v36 }
  0x34   :  { %v80_v45 = vcvt.s32.f32 %v78_v37  ;;  %v81_v46 = vmul.f32 5.9604645e-08, %v79_v38  ;;  %v104_v47 = vand.u32 16777215, %v102_v39  ;;  %v105_v48 = vcvt.s32.f32 %v103_v40 }
  0x35   :  { %v130_v49 = vand.u32 16777215, %v128_v41  ;;  %v131_v50 = vcvt.s32.f32 %v129_v42  ;;  %v156_v51 = vand.u32 16777215, %v154_v43  ;;  %v157_v52 = vcvt.s32.f32 %v155_v44 }
  0x36   :  { %v82_v53 = vmul.f32 5.9604645e-08, %v80_v45  ;;  %v106_v54 = vcvt.s32.f32 %v104_v47  ;;  %v107_v55 = vmul.f32 5.9604645e-08, %v105_v48  ;;  %v164_v56 = vadd.s32 341175252, %v488_v26 }
  0x37   :  { %v132_v57 = vcvt.s32.f32 %v130_v49  ;;  %v133_v58 = vmul.f32 5.9604645e-08, %v131_v50  ;;  %v158_v59 = vcvt.s32.f32 %v156_v51  ;;  %v159_v60 = vmul.f32 5.9604645e-08, %v157_v52 }
  0x38   :  { %v108_v61 = vmul.f32 5.9604645e-08, %v106_v54  ;;  %v109_v62 = vadd.f32 %v107_v55, %v81_v46  ;;  %v165_v63 = vshrl.u32 %v495_v31, 16  ;;  %v166_v0 = vshrl.u32 %v164_v56, 16 }
  0x39   :  { %v134_v1 = vmul.f32 5.9604645e-08, %v132_v57  ;;  %v160_v2 = vmul.f32 5.9604645e-08, %v158_v59  ;;  %v190_v3 = vadd.s32 2573952713, %v488_v26  ;;  %v191_v4 = vshrl.u32 %v498_v32, 16 }
  0x3a   :  { %v110_v5 = vadd.f32 %v108_v61, %v82_v53  ;;  %v135_v6 = vadd.f32 %v133_v58, %v109_v62  ;;  %v167_v7 = vxor.u32 %v165_v63, %v495_v31  ;;  %v168_v8 = vxor.u32 %v166_v0, %v164_v56 }
  0x3b   :  { %v192_v9 = vshrl.u32 %v190_v3, 16  ;;  %v193_v10 = vxor.u32 %v191_v4, %v498_v32  ;;  %v215_v11 = vadd.s32 511762878, %v486_v25  ;;  %v216_v12 = vadd.s32 511762878, %v488_v26 }
  0x3c   :  { %v136_v13 = vadd.f32 %v134_v1, %v110_v5  ;;  %v514_v14 = vadd.f32 %v159_v60, %v135_v6  ;;  %v169_v15 = vmul.u32 2146121005, %v167_v7  ;;  %v170_v16 = vmul.u32 2146121005, %v168_v8 }
  0x3d   :  { %v194_v17 = vxor.u32 %v192_v9, %v190_v3  ;;  %v195_v18 = vmul.u32 2146121005, %v193_v10  ;;  %v217_v19 = vshrl.u32 %v215_v11, 16  ;;  %v218_v20 = vshrl.u32 %v216_v12, 16 }
  0x3e   :  { %v516_v21 = vadd.f32 %v160_v2, %v136_v13  ;;  %v171_v31 = vshrl.u32 %v169_v15, 15  ;;  %v172_v22 = vshrl.u32 %v170_v16, 15  ;;  %v241_v23 = vadd.s32 2744540339, %v486_v25 }
  0x3f   :  { %v196_v32 = vmul.u32 2146121005, %v194_v17  ;;  %v197_v24 = vshrl.u32 %v195_v18, 15  ;;  %v219_v27 = vxor.u32 %v217_v19, %v215_v11  ;;  %v220_v28 = vxor.u32 %v218_v20, %v216_v12 }
  0x40   :  { %v173_v29 = vxor.u32 %v171_v31, %v169_v15  ;;  %v174_v30 = vxor.u32 %v172_v22, %v170_v16  ;;  %v242_v33 = vadd.s32 2744540339, %v488_v26  ;;  %v243_v34 = vshrl.u32 %v241_v23, 16 }
  0x41   :  { %v198_v35 = vshrl.u32 %v196_v32, 15  ;;  %v199_v36 = vxor.u32 %v197_v24, %v195_v18  ;;  %v221_v37 = vmul.u32 2146121005, %v219_v27  ;;  %v222_v38 = vmul.u32 2146121005, %v220_v28 }
  0x42   :  { %v175_v39 = vmul.u32 2221713035, %v173_v29  ;;  %v176_v40 = vmul.u32 2221713035, %v174_v30  ;;  %v244_v41 = vshrl.u32 %v242_v33, 16  ;;  %v245_v42 = vxor.u32 %v243_v34, %v241_v23 }
  0x43   :  { %v200_v43 = vxor.u32 %v198_v35, %v196_v32  ;;  %v201_v44 = vmul.u32 2221713035, %v199_v36  ;;  %v223_v45 = vshrl.u32 %v221_v37, 15  ;;  %v224_v46 = vshrl.u32 %v222_v38, 15 }
  0x44   :  { %v177_v47 = vshrl.u32 %v175_v39, 16  ;;  %v178_v48 = vshrl.u32 %v176_v40, 16  ;;  %v246_v49 = vxor.u32 %v244_v41, %v242_v33  ;;  %v247_v50 = vmul.u32 2146121005, %v245_v42 }
  0x45   :  { %v202_v51 = vmul.u32 2221713035, %v200_v43  ;;  %v203_v52 = vshrl.u32 %v201_v44, 16  ;;  %v225_v53 = vxor.u32 %v223_v45, %v221_v37  ;;  %v226_v54 = vxor.u32 %v224_v46, %v222_v38 }
  0x46   :  { %v179_v55 = vxor.u32 %v177_v47, %v175_v39  ;;  %v180_v56 = vxor.u32 %v178_v48, %v176_v40  ;;  %v248_v57 = vmul.u32 2146121005, %v246_v49  ;;  %v249_v58 = vshrl.u32 %v247_v50, 15 }
  0x47   :  { %v204_v59 = vshrl.u32 %v202_v51, 16  ;;  %v205_v60 = vxor.u32 %v203_v52, %v201_v44  ;;  %v227_v61 = vmul.u32 2221713035, %v225_v53  ;;  %v228_v62 = vmul.u32 2221713035, %v226_v54 }
  0x48   :  { %v181_v63 = vand.u32 16777215, %v179_v55  ;;  %v182_v0 = vand.u32 16777215, %v180_v56  ;;  %v250_v1 = vshrl.u32 %v248_v57, 15  ;;  %v251_v2 = vxor.u32 %v249_v58, %v247_v50 }
  0x49   :  { %v206_v3 = vxor.u32 %v204_v59, %v202_v51  ;;  %v207_v4 = vand.u32 16777215, %v205_v60  ;;  %v229_v5 = vshrl.u32 %v227_v61, 16  ;;  %v230_v6 = vshrl.u32 %v228_v62, 16 }
  0x4a   :  { %v183_v7 = vcvt.s32.f32 %v181_v63  ;;  %v184_v8 = vcvt.s32.f32 %v182_v0  ;;  %v252_v9 = vxor.u32 %v250_v1, %v248_v57  ;;  %v253_v10 = vmul.u32 2221713035, %v251_v2 }
  0x4b   :  { %v208_v11 = vand.u32 16777215, %v206_v3  ;;  %v209_v12 = vcvt.s32.f32 %v207_v4  ;;  %v231_v13 = vxor.u32 %v229_v5, %v227_v61  ;;  %v232_v15 = vxor.u32 %v230_v6, %v228_v62 }
  0x4c   :  { %v185_v16 = vmul.f32 5.9604645e-08, %v183_v7  ;;  %v186_v17 = vmul.f32 5.9604645e-08, %v184_v8  ;;  %v254_v18 = vmul.u32 2221713035, %v252_v9  ;;  %v255_v19 = vshrl.u32 %v253_v10, 16 }
  0x4d   :  { %v210_v20 = vcvt.s32.f32 %v208_v11  ;;  %v211_v31 = vmul.f32 5.9604645e-08, %v209_v12  ;;  %v233_v22 = vand.u32 16777215, %v231_v13  ;;  %v234_v23 = vand.u32 16777215, %v232_v15 }
  0x4e   :  { %v187_v32 = vadd.f32 %v185_v16, %v514_v14  ;;  %v188_v24 = vadd.f32 %v186_v17, %v516_v21  ;;  %v256_v27 = vshrl.u32 %v254_v18, 16  ;;  %v257_v28 = vxor.u32 %v255_v19, %v253_v10 }
  0x4f   :  { %v212_v29 = vmul.f32 5.9604645e-08, %v210_v20  ;;  %v235_v30 = vcvt.s32.f32 %v233_v22  ;;  %v236_v33 = vcvt.s32.f32 %v234_v23  ;;  %v267_v34 = vadd.s32 682350504, %v486_v25 }
  0x50   :  { %v213_v35 = vadd.f32 %v211_v31, %v187_v32  ;;  %v258_v36 = vxor.u32 %v256_v27, %v254_v18  ;;  %v259_v37 = vand.u32 16777215, %v257_v28  ;;  %v268_v38 = vadd.s32 682350504, %v488_v26 }
  0x51   :  { %v214_v39 = vadd.f32 %v212_v29, %v188_v24  ;;  %v237_v40 = vmul.f32 5.9604645e-08, %v235_v30  ;;  %v238_v41 = vmul.f32 5.9604645e-08, %v236_v33  ;;  %v269_v42 = vshrl.u32 %v267_v34, 16 }
  0x52   :  { %v260_v43 = vand.u32 16777215, %v258_v36  ;;  %v261_v14 = vcvt.s32.f32 %v259_v37  ;;  %v270_v44 = vshrl.u32 %v268_v38, 16  ;;  %v293_v21 = vadd.s32 2915127965, %v486_v25 }
  0x53   :  { %v239_v45 = vadd.f32 %v237_v40, %v213_v35  ;;  %v240_v46 = vadd.f32 %v238_v41, %v214_v39  ;;  %v271_v47 = vxor.u32 %v269_v42, %v267_v34  ;;  %v294_v48 = vadd.s32 2915127965, %v488_v26 }
  0x54   :  { %v262_v49 = vcvt.s32.f32 %v260_v43  ;;  %v263_v50 = vmul.f32 5.9604645e-08, %v261_v14  ;;  %v272_v51 = vxor.u32 %v270_v44, %v268_v38  ;;  %v295_v52 = vshrl.u32 %v293_v21, 16 }
  0x55   :  { %v273_v53 = vmul.u32 2146121005, %v271_v47  ;;  %v296_v54 = vshrl.u32 %v294_v48, 16  ;;  %v319_v55 = vadd.s32 852938130, %v486_v25 }
  0x56   :  { %v264_v56 = vmul.f32 5.9604645e-08, %v262_v49  ;;  %v527_v57 = vadd.f32 %v263_v50, %v239_v45  ;;  %v274_v58 = vmul.u32 2146121005, %v272_v51  ;;  %v297_v59 = vxor.u32 %v295_v52, %v293_v21 }
  0x57   :  { %v275_v60 = vshrl.u32 %v273_v53, 15  ;;  %v298_v61 = vxor.u32 %v296_v54, %v294_v48  ;;  %v320_v62 = vadd.s32 852938130, %v488_v26  ;;  %v321_v63 = vshrl.u32 %v319_v55, 16 }
  0x58   :  { %v530_v0 = vadd.f32 %v264_v56, %v240_v46  ;;  %v276_v1 = vshrl.u32 %v274_v58, 15  ;;  %v299_v2 = vmul.u32 2146121005, %v297_v59  ;;  %v345_v3 = vadd.s32 3085715591, %v486_v25 }
  0x59   :  { %v277_v4 = vxor.u32 %v275_v60, %v273_v53  ;;  %v300_v5 = vmul.u32 2146121005, %v298_v61  ;;  %v322_v6 = vshrl.u32 %v320_v62, 16  ;;  %v323_v7 = vxor.u32 %v321_v63, %v319_v55 }
  0x5a   :  { %v278_v8 = vxor.u32 %v276_v1, %v274_v58  ;;  %v301_v9 = vshrl.u32 %v299_v2, 15  ;;  %v346_v10 = vadd.s32 3085715591, %v488_v26  ;;  %v347_v11 = vshrl.u32 %v345_v3, 16 }
  0x5b   :  { %v279_v12 = vmul.u32 2221713035, %v277_v4  ;;  %v302_v13 = vshrl.u32 %v300_v5, 15  ;;  %v324_v15 = vxor.u32 %v322_v6, %v320_v62  ;;  %v325_v16 = vmul.u32 2146121005, %v323_v7 }
  0x5c   :  { %v280_v17 = vmul.u32 2221713035, %v278_v8  ;;  %v303_v18 = vxor.u32 %v301_v9, %v299_v2  ;;  %v348_v19 = vshrl.u32 %v346_v10, 16  ;;  %v349_v20 = vxor.u32 %v347_v11, %v345_v3 }
  0x5d   :  { %v281_v31 = vshrl.u32 %v279_v12, 16  ;;  %v304_v22 = vxor.u32 %v302_v13, %v300_v5  ;;  %v326_v25 = vmul.u32 2146121005, %v324_v15  ;;  %v327_v23 = vshrl.u32 %v325_v16, 15 }
  0x5e   :  { %v282_v32 = vshrl.u32 %v280_v17, 16  ;;  %v305_v24 = vmul.u32 2221713035, %v303_v18  ;;  %v350_v27 = vxor.u32 %v348_v19, %v346_v10  ;;  %v351_v28 = vmul.u32 2146121005, %v349_v20 }
  0x5f   :  { %v283_v29 = vxor.u32 %v281_v31, %v279_v12  ;;  %v306_v30 = vmul.u32 2221713035, %v304_v22  ;;  %v328_v26 = vshrl.u32 %v326_v25, 15  ;;  %v329_v33 = vxor.u32 %v327_v23, %v325_v16 }
  0x60   :  { %v284_v34 = vxor.u32 %v282_v32, %v280_v17  ;;  %v307_v35 = vshrl.u32 %v305_v24, 16  ;;  %v352_v36 = vmul.u32 2146121005, %v350_v27  ;;  %v353_v37 = vshrl.u32 %v351_v28, 15  ;;  %v373_v32 = vld [vmem:[#allocation4] sm:$0xff] }
  0x61   :  { %v285_v38 = vand.u32 16777215, %v283_v29  ;;  %v308_v39 = vshrl.u32 %v306_v30, 16  ;;  %v330_v40 = vxor.u32 %v328_v26, %v326_v25  ;;  %v331_v41 = vmul.u32 2221713035, %v329_v33 }
  0x62   :  { %v286_v42 = vand.u32 16777215, %v284_v34  ;;  %v309_v43 = vxor.u32 %v307_v35, %v305_v24  ;;  %v354_v14 = vshrl.u32 %v352_v36, 15  ;;  %v355_v44 = vxor.u32 %v353_v37, %v351_v28  ;;  %v374_v28 = vld [vmem:[#allocation4 + $0x8] sm:$0xff] }
  0x63   :  { %v287_v21 = vcvt.s32.f32 %v285_v38  ;;  %v310_v45 = vxor.u32 %v308_v39, %v306_v30  ;;  %v332_v46 = vmul.u32 2221713035, %v330_v40  ;;  %v333_v47 = vshrl.u32 %v331_v41, 16 }
  0x64   :  { %v288_v48 = vcvt.s32.f32 %v286_v42  ;;  %v311_v49 = vand.u32 16777215, %v309_v43  ;;  %v356_v50 = vxor.u32 %v354_v14, %v352_v36  ;;  %v357_v51 = vmul.u32 2221713035, %v355_v44 }
  0x65   :  { %v289_v52 = vmul.f32 5.9604645e-08, %v287_v21  ;;  %v312_v53 = vand.u32 16777215, %v310_v45  ;;  %v334_v54 = vshrl.u32 %v332_v46, 16  ;;  %v335_v55 = vxor.u32 %v333_v47, %v331_v41 }
  0x66   :  { %v290_v56 = vmul.f32 5.9604645e-08, %v288_v48  ;;  %v313_v58 = vcvt.s32.f32 %v311_v49  ;;  %v358_v59 = vmul.u32 2221713035, %v356_v50  ;;  %v359_v60 = vshrl.u32 %v357_v51, 16 }
  0x67   :  { %v291_v61 = vadd.f32 %v289_v52, %v527_v57  ;;  %v314_v62 = vcvt.s32.f32 %v312_v53  ;;  %v336_v63 = vxor.u32 %v334_v54, %v332_v46  ;;  %v337_v1 = vand.u32 16777215, %v335_v55 }
  0x68   :  { %v292_v2 = vadd.f32 %v290_v56, %v530_v0  ;;  %v315_v3 = vmul.f32 5.9604645e-08, %v313_v58  ;;  %v360_v4 = vshrl.u32 %v358_v59, 16  ;;  %v361_v5 = vxor.u32 %v359_v60, %v357_v51 }
  0x69   :  { %v316_v6 = vmul.f32 5.9604645e-08, %v314_v62  ;;  %v338_v7 = vand.u32 16777215, %v336_v63  ;;  %v339_v8 = vcvt.s32.f32 %v337_v1 }
  0x6a   :  { %v317_v9 = vadd.f32 %v315_v3, %v291_v61  ;;  %v362_v10 = vxor.u32 %v360_v4, %v358_v59  ;;  %v363_v11 = vand.u32 16777215, %v361_v5 }
  0x6b   :  { %v318_v12 = vadd.f32 %v316_v6, %v292_v2  ;;  %v340_v13 = vcvt.s32.f32 %v338_v7  ;;  %v341_v15 = vmul.f32 5.9604645e-08, %v339_v8 }
  0x6c   :  { %v364_v16 = vand.u32 16777215, %v362_v10  ;;  %v365_v17 = vcvt.s32.f32 %v363_v11 }
  0x6d   :  { %v342_v57 = vmul.f32 5.9604645e-08, %v340_v13  ;;  %v343_v18 = vadd.f32 %v341_v15, %v317_v9 }
  0x6e   :  { %v366_v19 = vcvt.s32.f32 %v364_v16  ;;  %v367_v20 = vmul.f32 5.9604645e-08, %v365_v17 }
  0x6f   :  { %v344_v31 = vadd.f32 %v342_v57, %v318_v12 }
  0x70   :  { %v368_v0 = vmul.f32 5.9604645e-08, %v366_v19  ;;  %v369_v22 = vadd.f32 %v367_v20, %v343_v18 }
  0x72   :  { %v370_v25 = vadd.f32 %v368_v0, %v344_v31  ;;  %v400_v23 = vadd.f32 -6.0, %v369_v22 }
  0x74   :  { %v401_v24 = vadd.f32 -6.0, %v370_v25  ;;  %v375_v27 = vmul.f32 0.5, %v400_v23 }
  0x76   :  { %v376_v29 = vmul.f32 0.5, %v401_v24  ;;  %v377_v30 = vadd.f32 %v375_v27, %v373_v32 }
  0x78   :  { %v378_v26 = vadd.f32 %v376_v29, %v374_v28  ;;  %379 = vst [vmem:[#allocation7] sm:$0xff] %v377_v30 }
  0x7a   :  { %380 = vst [vmem:[#allocation7 + $0x8] sm:$0xff] %v378_v26 }
  0x7b   :  { %393 = dma.vmem_to_hbm [thread:$0]  %s386_s1, 256, %s388_s21, [#allocation6], %s459_s14, %s459_s14, %s460_s15  }
  0x7c   :  { %456 = dma.done.wait [#allocation6], 256  }
  0x7d   :  { %457 = vsyncadd [#allocation6], 4294967040 }
  0x7e   :  { %398 = vsyncpa [#allocation5], 1 }
  0x7f   :  { %399 = vsyncpa [#allocation6], 1 }

</bundles_post_ra>
